<compile_context>
chip_gen: v5e
topology: v5e:2x2
jax: 0.10.0
libtpu: 0.0.40
codegen_flags: <defaults>
</compile_context>

<pallas_src>
import jax
import jax.numpy as jnp
from jax.experimental import pallas as pl
from jax.experimental.pallas import tpu as pltpu

IN_FEATURES = 784
OUT_FEATURES = 10


def linear_logsoftmax_kernel(x_ref, w_ref, b_ref, o_ref):
    # (TB, 784) @ (784, 10) -> (TB, 10), accumulated in f32 on the MXU.
    logits = jnp.dot(x_ref[...], w_ref[...], preferred_element_type=jnp.float32)
    logits = logits + b_ref[...]  # broadcast (1, 10), f32

    # Numerically-stable log_softmax along last axis (PyTorch dim=1), all in f32.
    m = jnp.max(logits, axis=-1, keepdims=True)
    shifted = logits - m
    lse = jnp.log(jnp.sum(jnp.exp(shifted), axis=-1, keepdims=True))
    o_ref[...] = (shifted - lse).astype(o_ref.dtype)


def _round_up(n, m):
    return ((n + m - 1) // m) * m


def _tpu_vmem_bytes():
    """Per-TensorCore VMEM capacity; fall back to 128 MiB if the query fails."""
    try:
        return int(pltpu.get_tpu_info().vmem_capacity_bytes)
    except Exception:
        return 128 << 20


def net_forward(x, w_t, b):
    """x: (B, 1, 28, 28) (or anything flattening to (B, 784)), any float dtype.
    w_t: (784, 10) transposed PyTorch weight.  b: (10,).
    Returns (B, 10) f32 log-probabilities."""
    B = x.shape[0]
    x2d = x.reshape(B, IN_FEATURES)            # free reshape; NO dtype cast (no extra HBM pass)
    in_dtype = x2d.dtype
    itemsize = jnp.dtype(in_dtype).itemsize
    w_k = w_t.astype(in_dtype)                 # resident 784x10 weight: dtype match is free
    b2d = b.reshape(1, OUT_FEATURES).astype(jnp.float32)

    # --- generation-aware tiling --------------------------------------------
    vmem_cap = _tpu_vmem_bytes()
    small_vmem = vmem_cap <= (64 << 20)        # v7x-class: 64 MiB VMEM, 2 TCs/chip
    tb_cap = 4096 if small_vmem else 8192      # 2 x-buffers stay well inside VMEM budget

    TB = min(tb_cap, _round_up(B, 8))
    if small_vmem:
        # Ensure >= 2 grid steps so "parallel" actually shards across both TensorCores.
        TB = min(TB, _round_up(pl.cdiv(B, 2), 8))
    TB = max(TB, 8)

    grid = (pl.cdiv(B, TB),)                   # partial edge block; no input padding

    if small_vmem:
        vmem_limit = min(max(vmem_cap - (8 << 20), 32 << 20), 56 << 20)
    else:
        vmem_limit = 100 << 20

    cost = pl.CostEstimate(
        flops=2 * B * IN_FEATURES * OUT_FEATURES,
        transcendentals=B * OUT_FEATURES,
        bytes_accessed=(B * IN_FEATURES * itemsize
                        + IN_FEATURES * OUT_FEATURES * itemsize
                        + B * OUT_FEATURES * 4),
    )

    out = pl.pallas_call(
        linear_logsoftmax_kernel,
        out_shape=jax.ShapeDtypeStruct((B, OUT_FEATURES), jnp.float32),
        grid_spec=pltpu.PrefetchScalarGridSpec(
            num_scalar_prefetch=0,
            grid=grid,
            in_specs=[
                pl.BlockSpec((TB, IN_FEATURES), lambda i: (i, 0)),            # x, streamed
                pl.BlockSpec((IN_FEATURES, OUT_FEATURES), lambda i: (0, 0)),  # weight, resident
                pl.BlockSpec((1, OUT_FEATURES), lambda i: (0, 0)),            # bias, resident
            ],
            out_specs=pl.BlockSpec((TB, OUT_FEATURES), lambda i: (i, 0)),
        ),
        compiler_params=pltpu.CompilerParams(
            dimension_semantics=("parallel",),   # megacore sharding on 2-TC chips
            vmem_limit_bytes=vmem_limit,
        ),
        cost_estimate=cost,
    )(x2d, w_k, b2d)

    return out


if __name__ == "__main__":
    key = jax.random.PRNGKey(0)
    kx, kw, kb = jax.random.split(key, 3)

    # Deterministic parameter init mimicking nn.Linear(784, 10):
    # uniform(-1/sqrt(784), 1/sqrt(784)) for both weight and bias.
    bound = 1.0 / jnp.sqrt(784.0)
    w = jax.random.uniform(kw, (10, 784), jnp.float32, -bound, bound)  # PyTorch (out, in)
    b = jax.random.uniform(kb, (10,), jnp.float32, -bound, bound)
    w_t = w.T                                                          # (784, 10)

    # Small example input consistent with the forward: (B, 1, 28, 28) -> 784 features.
    x = jax.random.normal(kx, (2, 1, 28, 28), jnp.float32)

    out = net_forward(x, w_t, b)
    out = jax.block_until_ready(out)

    # Reference check (pure JAX, f32).
    x2d = x.reshape(2, -1)
    ref_logits = x2d @ w_t + b
    ref = ref_logits - jax.scipy.special.logsumexp(ref_logits, axis=-1, keepdims=True)

    row_sums = jnp.exp(out).sum(axis=-1)
    assert out.shape == (2, 10)
    assert bool(jnp.allclose(row_sums, 1.0, atol=1e-5))
    # Loose tolerance covers default (bf16-pass) MXU precision for f32 inputs.
    assert bool(jnp.allclose(out, ref, atol=2e-2))

    print("KERNEL_OK")
</pallas_src>

<mosaic_0001>
module attributes {stable_mosaic.version = 11 : i64} {
  func.func @linear_logsoftmax_kernel(%arg0: i32, %arg1: memref<8x784xf32, #tpu.memory_space<vmem>>, %arg2: memref<784x10xf32, #tpu.memory_space<vmem>>, %arg3: memref<1x10xf32, #tpu.memory_space<vmem>>, %arg4: memref<8x10xf32, #tpu.memory_space<vmem>>) attributes {dimension_semantics = [#tpu.dimension_semantics<parallel>], iteration_bounds = array<i64: 1>, scalar_prefetch = 0 : i64, scratch_operands = 0 : i64, tpu.core_type = #tpu.core_type<tc>, window_params = [{transform_indices = @transform_0, window_bounds = array<i64: 8, 784>}, {pipeline_mode = #tpu.pipeline_mode<synchronous>, transform_indices = @transform_1, window_bounds = array<i64: 784, 10>}, {pipeline_mode = #tpu.pipeline_mode<synchronous>, transform_indices = @transform_2, window_bounds = array<i64: 1, 10>}, {transform_indices = @transform_3, window_bounds = array<i64: 8, 10>}]} {
    %c0 = arith.constant 0 : index
    %c0_0 = arith.constant 0 : index
    %0 = vector.load %arg1[%c0, %c0_0] : memref<8x784xf32, #tpu.memory_space<vmem>>, vector<8x784xf32>
    %c0_1 = arith.constant 0 : index
    %c0_2 = arith.constant 0 : index
    %1 = vector.load %arg2[%c0_1, %c0_2] : memref<784x10xf32, #tpu.memory_space<vmem>>, vector<784x10xf32>
    %cst = arith.constant dense<0.000000e+00> : vector<8x10xf32>
    %2 = tpu.matmul %0, %1, %cst {dimension_numbers = #tpu.dot_dimension_numbers<[1], [0], [0], [1], [0, 0, 1, 1], [], []>} : vector<8x784xf32>, vector<784x10xf32>, vector<8x10xf32> -> vector<8x10xf32>
    %c0_3 = arith.constant 0 : index
    %c0_4 = arith.constant 0 : index
    %3 = vector.load %arg3[%c0_3, %c0_4] : memref<1x10xf32, #tpu.memory_space<vmem>>, vector<1x10xf32>
    %4 = vector.broadcast %3 : vector<1x10xf32> to vector<8x10xf32>
    %5 = arith.addf %2, %4 : vector<8x10xf32>
    %cst_5 = arith.constant dense<0xFF800000> : vector<8xf32>
    %6 = vector.multi_reduction <maximumf>, %5, %cst_5 [1] : vector<8x10xf32> to vector<8xf32>
    %7 = vector.shape_cast %6 : vector<8xf32> to vector<8x1xf32>
    %8 = vector.broadcast %7 : vector<8x1xf32> to vector<8x10xf32>
    %9 = arith.subf %5, %8 : vector<8x10xf32>
    %10 = math.exp %9 : vector<8x10xf32>
    %cst_6 = arith.constant dense<0.000000e+00> : vector<8xf32>
    %11 = vector.multi_reduction <add>, %10, %cst_6 [1] : vector<8x10xf32> to vector<8xf32>
    %12 = vector.shape_cast %11 : vector<8xf32> to vector<8x1xf32>
    %13 = math.log %12 : vector<8x1xf32>
    %14 = vector.broadcast %13 : vector<8x1xf32> to vector<8x10xf32>
    %15 = arith.subf %9, %14 : vector<8x10xf32>
    %c0_7 = arith.constant 0 : index
    %c0_8 = arith.constant 0 : index
    %16 = vector.load %arg4[%c0_7, %c0_8] : memref<8x10xf32, #tpu.memory_space<vmem>>, vector<8x10xf32>
    tpu.vector_store %arg4[%c0_7, %c0_8], %15 {strides = array<i32>} : memref<8x10xf32, #tpu.memory_space<vmem>>, vector<8x10xf32>,
    return
  }
  func.func @transform_0(%arg0: i32) -> (i32, i32) {
    %c0_i32 = arith.constant 0 : i32
    %c0_i32_0 = arith.constant 0 : i32
    return %arg0, %c0_i32 : i32, i32
  }
  func.func @transform_1(%arg0: i32) -> (i32, i32) {
    %c0_i32 = arith.constant 0 : i32
    %c0_i32_0 = arith.constant 0 : i32
    %c0_i32_1 = arith.constant 0 : i32
    return %c0_i32, %c0_i32_0 : i32, i32
  }
  func.func @transform_2(%arg0: i32) -> (i32, i32) {
    %c0_i32 = arith.constant 0 : i32
    %c0_i32_0 = arith.constant 0 : i32
    %c0_i32_1 = arith.constant 0 : i32
    return %c0_i32, %c0_i32_0 : i32, i32
  }
  func.func @transform_3(%arg0: i32) -> (i32, i32) {
    %c0_i32 = arith.constant 0 : i32
    %c0_i32_0 = arith.constant 0 : i32
    return %arg0, %c0_i32 : i32, i32
  }
}

</mosaic_0001>

<bundles_post_ra>
// kernel: tpu_custom_call.1
= control target key start
LH: loop header
LB: loop body
LE: loop exit
PB: predicated region body
PF: predicated region fallthrough
CT: control target
= control target key end

     0   :  { %8 = vsyncpa [#allocation3], 0  ;;  %vm161_vm0 = vcmask 130048   ;;  %vm304_vm1 = vcmask 80896   ;;  %s721_s0 = inlined_call_operand.vmem [shape: f32[2,784], index: 0, kind: input, shape index: {}]   ;;  %s722_s1 = inlined_call_operand.vmem [shape: f32[784,10], index: 1, kind: input, shape index: {}]   ;;  %s723_s2 = inlined_call_operand.vmem [shape: f32[1,10], index: 2, kind: input, shape index: {}]   ;;  %s724_s3 = inlined_call_operand.hbm [shape: f32[2,10], index: 3, kind: output, shape index: {}]  }
   0x1   :  { %v38_v0 = vld [vmem:[%s722_s1 + $0x78] sm:$0xff]  ;;  %v37_v1 = vld [vmem:[%s722_s1 + $0x70] sm:$0xff]  ;;  %v36_v4 = vld [vmem:[%s722_s1 + $0x68] sm:$0xff] }
   0x2   :  { %164 = vmatpush.msra.mxu0 %v38_v0  ;;  %v54_v2 = vld [vmem:[%s722_s1 + $0xf8] sm:$0xff]  ;;  %v53_v3 = vld [vmem:[%s722_s1 + $0xf0] sm:$0xff]  ;;  %v52_v5 = vld [vmem:[%s722_s1 + $0xe8] sm:$0xff] }
   0x3   :  { %184 = vmatpush.msra.mxu1 %v54_v2  ;;  %v35_v6 = vld [vmem:[%s722_s1 + $0x60] sm:$0xff]  ;;  %v34_v8 = vld [vmem:[%s722_s1 + $0x58] sm:$0xff]  ;;  %v33_v11 = vld [vmem:[%s722_s1 + $0x50] sm:$0xff] }
   0x4   :  { %165 = vmatpush.msra.mxu0 %v37_v1  ;;  %v51_v7 = vld [vmem:[%s722_s1 + $0xe0] sm:$0xff]  ;;  %v50_v9 = vld [vmem:[%s722_s1 + $0xd8] sm:$0xff]  ;;  %v69_v12 = vld [vmem:[%s722_s1 + $0x170] sm:$0xff] }
   0x5   :  { %185 = vmatpush.msra.mxu1 %v53_v3  ;;  %v70_v10 = vld [vmem:[%s722_s1 + $0x178] sm:$0xff]  ;;  %v49_v14 = vld [vmem:[%s722_s1 + $0xd0] sm:$0xff]  ;;  %v68_v15 = vld [vmem:[%s722_s1 + $0x168] sm:$0xff] }
   0x6   :  { %166 = vmatpush.msra.mxu0 %v36_v4  ;;  %204 = vmatpush.msra.mxu2 %v70_v10  ;;  %v86_v13 = vld [vmem:[%s722_s1 + $0x1f8] sm:$0xff]  ;;  %v32_v16 = vld [vmem:[%s722_s1 + $0x48] sm:$0xff]  ;;  %v85_v17 = vld [vmem:[%s722_s1 + $0x1f0] sm:$0xff] }
   0x7   :  { %186 = vmatpush.msra.mxu1 %v52_v5  ;;  %224 = vmatpush.msra.mxu3 %v86_v13  ;;  %v48_v18 = vld [vmem:[%s722_s1 + $0xc8] sm:$0xff]  ;;  %v67_v19 = vld [vmem:[%s722_s1 + $0x160] sm:$0xff]  ;;  %v66_v24 = vld [vmem:[%s722_s1 + $0x158] sm:$0xff] }
   0x8   :  { %167 = vmatpush.msra.mxu0 %v35_v6  ;;  %205 = vmatpush.msra.mxu2 %v69_v12  ;;  %v84_v20 = vld [vmem:[%s722_s1 + $0x1e8] sm:$0xff]  ;;  %v31_v21 = vld [vmem:[%s722_s1 + $0x40] sm:$0xff]  ;;  %v30_v25 = vld [vmem:[%s722_s1 + $0x38] sm:$0xff] }
   0x9   :  { %187 = vmatpush.msra.mxu1 %v51_v7  ;;  %225 = vmatpush.msra.mxu3 %v85_v17  ;;  %v83_v22 = vld [vmem:[%s722_s1 + $0x1e0] sm:$0xff]  ;;  %v82_v26 = vld [vmem:[%s722_s1 + $0x1d8] sm:$0xff]  ;;  %v65_v28 = vld [vmem:[%s722_s1 + $0x150] sm:$0xff] }
   0xa   :  { %168 = vmatpush.msra.mxu0 %v34_v8  ;;  %206 = vmatpush.msra.mxu2 %v68_v15  ;;  %v47_v23 = vld [vmem:[%s722_s1 + $0xc0] sm:$0xff]  ;;  %v46_v27 = vld [vmem:[%s722_s1 + $0xb8] sm:$0xff]  ;;  %v29_v29 = vld [vmem:[%s722_s1 + $0x30] sm:$0xff] }
   0xb   :  { %188 = vmatpush.msra.mxu1 %v50_v9  ;;  %226 = vmatpush.msra.mxu3 %v84_v20  ;;  %v81_v30 = vld [vmem:[%s722_s1 + $0x1d0] sm:$0xff]  ;;  %v64_v32 = vld [vmem:[%s722_s1 + $0x148] sm:$0xff]  ;;  %v63_v36 = vld [vmem:[%s722_s1 + $0x140] sm:$0xff] }
   0xc   :  { %169 = vmatpush.msra.mxu0 %v33_v11  ;;  %207 = vmatpush.msra.mxu2 %v67_v19  ;;  %v45_v31 = vld [vmem:[%s722_s1 + $0xb0] sm:$0xff]  ;;  %v28_v33 = vld [vmem:[%s722_s1 + $0x28] sm:$0xff]  ;;  %v27_v37 = vld [vmem:[%s722_s1 + $0x20] sm:$0xff] }
   0xd   :  { %189 = vmatpush.msra.mxu1 %v49_v14  ;;  %227 = vmatpush.msra.mxu3 %v83_v22  ;;  %v80_v34 = vld [vmem:[%s722_s1 + $0x1c8] sm:$0xff]  ;;  %v79_v38 = vld [vmem:[%s722_s1 + $0x1c0] sm:$0xff]  ;;  %v62_v40 = vld [vmem:[%s722_s1 + $0x138] sm:$0xff] }
   0xe   :  { %170 = vmatpush.msra.mxu0 %v32_v16  ;;  %208 = vmatpush.msra.mxu2 %v66_v24  ;;  %v44_v35 = vld [vmem:[%s722_s1 + $0xa8] sm:$0xff]  ;;  %v43_v39 = vld [vmem:[%s722_s1 + $0xa0] sm:$0xff]  ;;  %v26_v41 = vld [vmem:[%s722_s1 + $0x18] sm:$0xff] }
   0xf   :  { %190 = vmatpush.msra.mxu1 %v48_v18  ;;  %228 = vmatpush.msra.mxu3 %v82_v26  ;;  %v78_v42 = vld [vmem:[%s722_s1 + $0x1b8] sm:$0xff]  ;;  %v61_v44 = vld [vmem:[%s722_s1 + $0x130] sm:$0xff]  ;;  %v60_v48 = vld [vmem:[%s722_s1 + $0x128] sm:$0xff] }
  0x10   :  { %171 = vmatpush.msra.mxu0 %v31_v21  ;;  %209 = vmatpush.msra.mxu2 %v65_v28  ;;  %v42_v43 = vld [vmem:[%s722_s1 + $0x98] sm:$0xff]  ;;  %v25_v45 = vld [vmem:[%s722_s1 + $0x10] sm:$0xff]  ;;  %v24_v49 = vld [vmem:[%s722_s1 + $0x8] sm:$0xff] }
  0x11   :  { %191 = vmatpush.msra.mxu1 %v47_v23  ;;  %229 = vmatpush.msra.mxu3 %v81_v30  ;;  %v77_v46 = vld [vmem:[%s722_s1 + $0x1b0] sm:$0xff]  ;;  %v23_v50 = vld [vmem:[%s722_s1] sm:$0xff]  ;;  %v76_v51 = vld [vmem:[%s722_s1 + $0x1a8] sm:$0xff] }
  0x12   :  { %172 = vmatpush.msra.mxu0 %v30_v25  ;;  %210 = vmatpush.msra.mxu2 %v64_v32  ;;  %v41_v47 = vld [vmem:[%s722_s1 + $0x90] sm:$0xff]  ;;  %v40_v52 = vld [vmem:[%s722_s1 + $0x88] sm:$0xff]  ;;  %v102_v53 = vld [vmem:[%s722_s1 + $0x278] sm:$0xff] }
  0x13   :  { %192 = vmatpush.msra.mxu1 %v46_v27  ;;  %230 = vmatpush.msra.mxu3 %v80_v34  ;;  %v59_v54 = vld [vmem:[%s722_s1 + $0x120] sm:$0xff]  ;;  %v17_v57 = vld [vmem:[%s721_s0 + $0xe] sm:$0xff]  ;;  %v118_v62 = vld [vmem:[%s722_s1 + $0x2f8] sm:$0xff] }
  0x14   :  { %173 = vmatpush.msra.mxu0 %v29_v29  ;;  %211 = vmatpush.msra.mxu2 %v63_v36  ;;  %v75_v55 = vld [vmem:[%s722_s1 + $0x1a0] sm:$0xff]  ;;  %v21_v60 = vld [vmem:[%s721_s0 + $0x2a] sm:$0xff]  ;;  %v58_v63 = vld [vmem:[%s722_s1 + $0x118] sm:$0xff]  ;;  %135 = vst [vmem:[#allocation1 + $0x1] ss:$4 sm:$0xff] %v17_v57 }
  0x15   :  { %193 = vmatpush.msra.mxu1 %v45_v31  ;;  %231 = vmatpush.msra.mxu3 %v79_v38  ;;  %v15_v56 = vld [vmem:[%s721_s0] sm:$0xff]  ;;  %v101_v61 = vld [vmem:[%s722_s1 + $0x270] sm:$0xff]  ;;  %v100_v0 = vld [vmem:[%s722_s1 + $0x268] sm:$0xff]  ;;  %139 = vst [vmem:[#allocation1 + $0x3] ss:$4 sm:$0xff] %v21_v60 }
  0x16   :  { %174 = vmatpush.msra.mxu0 %v28_v33  ;;  %212 = vmatpush.msra.mxu2 %v62_v40  ;;  %v39_v58 = vld [vmem:[%s722_s1 + $0x80] sm:$0xff]  ;;  %133 = vst [vmem:[#allocation1] ss:$4 sm:$0xff] %v15_v56  ;;  %v117_v1 = vld [vmem:[%s722_s1 + $0x2f0] sm:$0xff]  ;;  %v74_v2 = vld [vmem:[%s722_s1 + $0x198] sm:$0xff] }
  0x17   :  { %194 = vmatpush.msra.mxu1 %v44_v35  ;;  %232 = vmatpush.msra.mxu3 %v78_v42  ;;  %v19_v59 = vld [vmem:[%s721_s0 + $0x1c] sm:$0xff]  ;;  %v116_v3 = vld [vmem:[%s722_s1 + $0x2e8] sm:$0xff]  ;;  %v57_v4 = vld [vmem:[%s722_s1 + $0x110] sm:$0xff] }
  0x18   :  { %175 = vmatpush.msra.mxu0 %v27_v37  ;;  %213 = vmatpush.msra.mxu2 %v61_v44  ;;  %137 = vst [vmem:[#allocation1 + $0x2] ss:$4 sm:$0xff] %v19_v59  ;;  %v56_v5 = vld [vmem:[%s722_s1 + $0x108] sm:$0xff]  ;;  %v73_v6 = vld [vmem:[%s722_s1 + $0x190] sm:$0xff]  ;;  %v99_v11 = vld [vmem:[%s722_s1 + $0x260] sm:$0xff] }
  0x19   :  { %195 = vmatpush.msra.mxu1 %v43_v39  ;;  %233 = vmatpush.msra.mxu3 %v77_v46  ;;  %v16_v7 = vld [vmem:[%s721_s0 + $0x8] sm:$0x3f]  ;;  %v18_v8 = vld [vmem:[%s721_s0 + $0x16] sm:$0x3f]  ;;  %v115_v13 = vld [vmem:[%s722_s1 + $0x2e0] sm:$0xff] }
  0x1a   :  { %176 = vmatpush.msra.mxu0 %v26_v41  ;;  %214 = vmatpush.msra.mxu2 %v60_v48  ;;  %v20_v9 = vld [vmem:[%s721_s0 + $0x24] sm:$0x3f]  ;;  %v22_v10 = vld [vmem:[%s721_s0 + $0x32] sm:$0x3f]  ;;  %141 = vst [vmem:[#allocation1 + $0x20] ss:$4 sm:$0xff] %v16_v7 }
  0x1b   :  { %196 = vmatpush.msra.mxu1 %v42_v43  ;;  %234 = vmatpush.msra.mxu3 %v76_v51  ;;  %v72_v12 = vld [vmem:[%s722_s1 + $0x188] sm:$0xff]  ;;  %143 = vst [vmem:[#allocation1 + $0x21] ss:$4 sm:$0xff] %v18_v8  ;;  %v55_v14 = vld [vmem:[%s722_s1 + $0x100] sm:$0xff]  ;;  %v98_v15 = vld [vmem:[%s722_s1 + $0x258] sm:$0xff] }
  0x1c   :  { %177 = vmatpush.msra.mxu0 %v25_v45  ;;  %215 = vmatpush.msra.mxu2 %v59_v54  ;;  %145 = vst [vmem:[#allocation1 + $0x22] ss:$4 sm:$0xff] %v20_v9  ;;  %v114_v16 = vld [vmem:[%s722_s1 + $0x2d8] sm:$0xff]  ;;  %v120_v17 = vld [vmem:[%s722_s1 + $0x308] sm:$0xff]  ;;  %v97_v18 = vld [vmem:[%s722_s1 + $0x250] sm:$0xff] }
  0x1d   :  { %197 = vmatpush.msra.mxu1 %v41_v47  ;;  %235 = vmatpush.msra.mxu3 %v75_v55  ;;  %147 = vst [vmem:[#allocation1 + $0x23] ss:$4 sm:$0xff] %v22_v10  ;;  %v71_v20 = vld [vmem:[%s722_s1 + $0x180] sm:$0xff]  ;;  %v113_v21 = vld [vmem:[%s722_s1 + $0x2d0] sm:$0xff]  ;;  %v96_v23 = vld [vmem:[%s722_s1 + $0x248] sm:$0xff] }
  0x1e   :  { %178 = vmatpush.msra.mxu0 %v24_v49  ;;  %216 = vmatpush.msra.mxu2 %v58_v63  ;;  %v112_v25 = vld [vmem:[%s722_s1 + $0x2c8] sm:$0xff]  ;;  %v119_v26 = vld [vmem:[%s722_s1 + $0x300] sm:$0xff]  ;;  %v94_v30 = vld [vmem:[%s722_s1 + $0x238] sm:$0xff] }
  0x1f   :  { %198 = vmatpush.msra.mxu1 %v40_v52  ;;  %236 = vmatpush.msra.mxu3 %v74_v2  ;;  %v150_v19 = vld.sshfl [vmem:[#allocation1 + $0x10] sm:$0xff pattern:$0x73625140]  ;;  %v148_v22 = vld.sshfl [vmem:[#allocation1] sm:$0xff pattern:$0x73625140] }
  0x20   :  { %179 = vmatpush.msra.mxu0 %v23_v50  ;;  %217 = vmatpush.msra.mxu2 %v57_v4  ;;  %v151_v24 = vld.sshfl [vmem:[#allocation1 + $0x18] sm:$0xff pattern:$0x73625140]  ;;  %v95_v27 = vld [vmem:[%s722_s1 + $0x240] sm:$0xff]  ;;  %v93_v33 = vld [vmem:[%s722_s1 + $0x230] sm:$0xff] }
  0x21   :  { %199 = vmatpush.msra.mxu1 %v39_v58  ;;  %237 = vmatpush.msra.mxu3 %v73_v6  ;;  %v149_v28 = vld.sshfl [vmem:[#allocation1 + $0x8] sm:$0xff pattern:$0x73625140]  ;;  %v111_v29 = vld [vmem:[%s722_s1 + $0x2c0] sm:$0xff]  ;;  %v110_v32 = vld [vmem:[%s722_s1 + $0x2b8] sm:$0xff] }
  0x22   :  { %244 = vmatpush.msrb.mxu0 %v102_v53  ;;  %218 = vmatpush.msra.mxu2 %v56_v5  ;;  %v109_v34 = vld [vmem:[%s722_s1 + $0x2b0] sm:$0xff]  ;;  %v92_v35 = vld [vmem:[%s722_s1 + $0x228] sm:$0xff]  ;;  %v91_v37 = vld [vmem:[%s722_s1 + $0x220] sm:$0xff] }
  0x23   :  { %264 = vmatpush.msrb.mxu1 %v118_v62  ;;  %238 = vmatpush.msra.mxu3 %v72_v12  ;;  %v108_v36 = vld [vmem:[%s722_s1 + $0x2a8] sm:$0xff]  ;;  %v107_v38 = vld [vmem:[%s722_s1 + $0x2a0] sm:$0xff]  ;;  %v90_v39 = vld [vmem:[%s722_s1 + $0x218] sm:$0xff] }
  0x24   :  { %245 = vmatpush.msrb.mxu0 %v101_v61  ;;  %219 = vmatpush.msra.mxu2 %v55_v14  ;;  %v154_v31 = vld.sshfl [vmem:[#allocation1 + $0x30] sm:$0xff pattern:$0x73625140]  ;;  %v106_v40 = vld [vmem:[%s722_s1 + $0x298] sm:$0xff]  ;;  %v88_v43 = vld [vmem:[%s722_s1 + $0x208] sm:$0xff] }
  0x25   :  { %265 = vmatpush.msrb.mxu1 %v117_v1  ;;  %220 = vmatmul.f32.vlgmr.msra.gmra.mxu2 %v150_v19  ;;  %v89_v41 = vld [vmem:[%s722_s1 + $0x210] sm:$0xff]  ;;  %v104_v44 = vld [vmem:[%s722_s1 + $0x288] sm:$0xff]  ;;  %v87_v45 = vld [vmem:[%s722_s1 + $0x200] sm:$0xff] }
  0x26   :  { %246 = vmatpush.msrb.mxu0 %v100_v0  ;;  %298 = vmatpush.msrb.mxu2 %v120_v17  ;;  %v105_v42 = vld [vmem:[%s722_s1 + $0x290] sm:$0xff]  ;;  %v152_v46 = vld.sshfl [vmem:[#allocation1 + $0x20] sm:$0xff pattern:$0x73625140] }
  0x27   :  { %266 = vmatpush.msrb.mxu1 %v116_v3  ;;  %239 = vmatpush.msra.mxu3 %v71_v20  ;;  %v103_v47 = vld [vmem:[%s722_s1 + $0x280] sm:$0xff]  ;;  %v153_v48 = vld.sshfl [vmem:[#allocation1 + $0x28] sm:$0xff pattern:$0x73625140] }
  0x28   :  { %247 = vmatpush.msrb.mxu0 %v99_v11  ;;  %240 = vmatmul.f32.vlgmr.msra.gmra.mxu3 %v151_v24  ;;  %v340_v49 = vld [vmem:[%s723_s2] ss:$0 sm:$0xff] }
  0x29   :  { %267 = vmatpush.msrb.mxu1 %v115_v13  ;;  %180 = vmatmul.f32.vlgmr.msra.gmra.mxu0 %v148_v22 }
  0x2a   :  { %248 = vmatpush.msrb.mxu0 %v98_v15  ;;  %299 = vmatpush.msrb.mxu2 %v119_v26 }
  0x2b   :  { %268 = vmatpush.msrb.mxu1 %v114_v16 }
  0x2c   :  { %249 = vmatpush.msrb.mxu0 %v97_v18  ;;  %200 = vmatmul.f32.vlgmr.msra.gmra.mxu1 %v149_v28 }
  0x2d   :  { %269 = vmatpush.msrb.mxu1 %v113_v21  ;;  %336 = vmatmul.msk.f32.vlgmr.msrb.gmra.mxu2 %vm161_vm0, %v154_v31 }
  0x2e   :  { %250 = vmatpush.msrb.mxu0 %v96_v23 }
  0x2f   :  { %270 = vmatpush.msrb.mxu1 %v112_v25 }
  0x30   :  { %251 = vmatpush.msrb.mxu0 %v95_v27 }
  0x31   :  { %271 = vmatpush.msrb.mxu1 %v111_v29 }
  0x32   :  { %252 = vmatpush.msrb.mxu0 %v94_v30 }
  0x33   :  { %272 = vmatpush.msrb.mxu1 %v110_v32 }
  0x34   :  { %253 = vmatpush.msrb.mxu0 %v93_v33 }
  0x35   :  { %273 = vmatpush.msrb.mxu1 %v109_v34 }
  0x36   :  { %254 = vmatpush.msrb.mxu0 %v92_v35 }
  0x37   :  { %274 = vmatpush.msrb.mxu1 %v108_v36 }
  0x38   :  { %255 = vmatpush.msrb.mxu0 %v91_v37 }
  0x39   :  { %275 = vmatpush.msrb.mxu1 %v107_v38 }
  0x3a   :  { %256 = vmatpush.msrb.mxu0 %v90_v39 }
  0x3b   :  { %276 = vmatpush.msrb.mxu1 %v106_v40 }
  0x3c   :  { %257 = vmatpush.msrb.mxu0 %v89_v41 }
  0x3d   :  { %277 = vmatpush.msrb.mxu1 %v105_v42 }
  0x3e   :  { %258 = vmatpush.msrb.mxu0 %v88_v43 }
  0x3f   :  { %278 = vmatpush.msrb.mxu1 %v104_v44 }
  0x40   :  { %259 = vmatpush.msrb.mxu0 %v87_v45 }
  0x41   :  { %260 = vmatmul.f32.vlgmr.msrb.gmra.mxu0 %v152_v46  ;;  %279 = vmatpush.msrb.mxu1 %v103_v47 }
  0x42   :  { %280 = vmatmul.f32.vlgmr.msrb.gmra.mxu1 %v153_v48 }
  0xa6   :  { %v181_v50 = vpop.f32.mrf.mxu0 }
  0xa7   :  { %v182_v51 = vadd.f32 %v340_v49, %v181_v50 }
  0xa8   :  { %v221_v54 = vpop.f32.mrf.mxu2 }
  0xa9   :  { %v201_v52 = vpop.f32.mrf.mxu1 }
  0xaa   :  { %v202_v53 = vadd.f32 %v201_v52, %v182_v51 }
  0xab   :  { %v241_v56 = vpop.f32.mrf.mxu3 }
  0xac   :  { %v222_v55 = vadd.f32 %v221_v54, %v202_v53 }
  0xae   :  { %v242_v57 = vadd.f32 %v241_v56, %v222_v55 }
  0xb0   :  { %v301_v61 = vpop.f32.mrf.mxu2 }
  0xbe   :  { %v261_v58 = vpop.f32.mrf.mxu0 }
  0xbf   :  { %v262_v59 = vadd.f32 %v261_v58, %v242_v57  ;;  %v281_v60 = vpop.f32.mrf.mxu1 }
  0xc1   :  { %v282_v62 = vadd.f32 %v281_v60, %v262_v59 }
  0xc3   :  { %v302_v63 = vadd.f32 %v301_v61, %v282_v62 }
  0xc5   :  { %v305_v0 = vsel %vm304_vm1, %v302_v63, -inf }
  0xc6   :  { %306 = vmax.xlane.f32.xlu0 %v305_v0 }
 0x139   :  { %v307_v1 = vpop.xlane.xlu0 %306 }
 0x13a   :  { %v308_v2 = vsub.f32 %v302_v63, %v307_v1 }
 0x13c   :  { %v309_v3 = vmul.f32 1.442695, %v308_v2 }
 0x13e   :  { %341 = vpow2.f32 %v309_v3 }
 0x144   :  { %v342_v4 = vpop.eup %341 }
 0x145   :  { %v311_v5 = vsel %vm304_vm1, %v342_v4, 0.0 }
 0x146   :  { %312 = vadd.xlane.f32.xlu0 %v311_v5 }
 0x1b9   :  { %v313_v6 = vpop.xlane.xlu0 %312 }
 0x1ba   :  { %343 = vlog2.f32 %v313_v6 }
 0x1c0   :  { %v344_v7 = vpop.eup %343 }
 0x1c1   :  { %v315_v8 = vmul.f32 0.6931472, %v344_v7 }
 0x1c3   :  { %v316_v9 = vsub.f32 %v308_v2, %v315_v8 }
 0x1c5   :  { %317 = vst.msk [vmem:[#allocation2] sm:$0xff] %vm304_vm1, %v316_v9 }
 0x1c6   :  { %321 = vsyncadd [#allocation3], 96  ;;  %s324_s7 = sshll.u32 %s724_s3, 4  ;;  %s371_s8 = smov [#allocation2]   ;;  %s325_s7 = int_to_ptr.hbm [resolvable:$true] %s324_s7 }
 0x1c7   :  { %s322_s9 = sshll.u32 %s371_s8, 4  ;;  %s372_s10 = smov 32   ;;  %s323_s9 = int_to_ptr.vmem [resolvable:$true] %s322_s9 }
 0x1c8   :  { %s373_s11 = smov 2  }
 0x1c9   :  { %330 = dma.vmem_to_hbm [thread:$0]  %s323_s9, 32, %s325_s7, [#allocation3], %s372_s10, %s372_s10, %s373_s11  }
 0x1ca   :  { %369 = dma.done.wait [#allocation3], 128  }
 0x1cb   :  { %370 = vsyncadd [#allocation3], 4294967168 }
 0x1cc   :  { %335 = vsyncpa [#allocation3], 1 }

</bundles_post_ra>
